<compile_context>
chip_gen: v5e
topology: v5e:2x2
jax: 0.10.0
libtpu: 0.0.40
codegen_flags: <defaults>
</compile_context>

<pallas_src>
import jax
import jax.numpy as jnp
from jax.experimental import pallas as pl
from jax.experimental.pallas import tpu as pltpu


def _round_up(x, m):
    return ((x + m - 1) // m) * m


def _fused_kernel(x_ref, mask_ref, w_ref, b_ref, out_ref):
    # x_ref:   (TM, Din)   flattened node features tile
    # mask_ref:(TM, 1)     valid-node mask tile
    # w_ref:   (Din, 2L)   pre-fused  W_embed.T @ W_proj.T
    # b_ref:   (1, 2L)     latent_projection.bias
    # out_ref: (TM, 2L)    masked [mean | logvar]
    ml = jnp.dot(x_ref[...], w_ref[...], preferred_element_type=jnp.float32)
    ml = ml + b_ref[...]
    out_ref[...] = (ml * mask_ref[...]).astype(out_ref.dtype)


def _unfused_kernel(x_ref, mask_ref, w_emb_t_ref, w_proj_t_ref, b_ref, out_ref):
    # Two-matmul path (weights pre-transposed in the wrapper; no in-kernel .T).
    h = jnp.dot(x_ref[...], w_emb_t_ref[...], preferred_element_type=jnp.float32)
    # encode(): abstract in base class -> identity (adjacency unused).
    ml = jnp.dot(h, w_proj_t_ref[...], preferred_element_type=jnp.float32)
    ml = ml + b_ref[...]
    out_ref[...] = (ml * mask_ref[...]).astype(out_ref.dtype)


def graph_encoder_forward(node_features, adjacency_matrix, node_mask,
                          w_embed, w_proj, b_proj,
                          *, fuse_weights=True, block_m=512):
    """Returns (mean, logvar) of the diagonal-Gaussian posterior, node-masked."""
    del adjacency_matrix  # dead data while encode() is identity -> never DMA'd
    B, N, Din = node_features.shape
    H = w_embed.shape[0]
    twoL = w_proj.shape[0]
    L = twoL // 2

    # Flatten batch*nodes into one big M dimension and tile it.
    M = B * N
    x2d = node_features.reshape(M, Din).astype(jnp.float32)
    mask2d = node_mask.reshape(M, 1).astype(jnp.float32)

    tm = min(block_m, _round_up(M, 8))          # tile rows (sublane-aligned)
    M_pad = _round_up(M, tm)
    if M_pad != M:
        x2d = jnp.pad(x2d, ((0, M_pad - M), (0, 0)))
        mask2d = jnp.pad(mask2d, ((0, M_pad - M), (0, 0)))

    b2d = b_proj.reshape(1, twoL).astype(jnp.float32)
    grid = (M_pad // tm,)

    if fuse_weights:
        # encode() is identity -> fold the two Linears:  x @ (W_e.T @ W_p.T) + b
        w_comb = (w_embed.T @ w_proj.T).astype(jnp.float32)     # [Din, 2L]
        kernel = _fused_kernel
        weight_args = (w_comb, b2d)
        weight_specs = [
            pl.BlockSpec((Din, twoL), lambda i: (0, 0)),
            pl.BlockSpec((1, twoL), lambda i: (0, 0)),
        ]
    else:
        w_emb_t = w_embed.T.astype(jnp.float32)                 # [Din, H]
        w_proj_t = w_proj.T.astype(jnp.float32)                 # [H, 2L]
        kernel = _unfused_kernel
        weight_args = (w_emb_t, w_proj_t, b2d)
        weight_specs = [
            pl.BlockSpec((Din, H), lambda i: (0, 0)),
            pl.BlockSpec((H, twoL), lambda i: (0, 0)),
            pl.BlockSpec((1, twoL), lambda i: (0, 0)),
        ]

    ml = pl.pallas_call(
        kernel,
        out_shape=jax.ShapeDtypeStruct((M_pad, twoL), jnp.float32),
        grid_spec=pltpu.PrefetchScalarGridSpec(
            num_scalar_prefetch=0,
            grid=grid,
            in_specs=[
                pl.BlockSpec((tm, Din), lambda i: (i, 0)),      # node features tile
                pl.BlockSpec((tm, 1), lambda i: (i, 0)),        # node mask tile
                *weight_specs,                                   # broadcast weights
            ],
            out_specs=pl.BlockSpec((tm, twoL), lambda i: (i, 0)),
        ),
        compiler_params=pltpu.CompilerParams(
            dimension_semantics=("parallel",)),
    )(x2d, mask2d, *weight_args)

    # Split mean / logvar outside the kernel (plain XLA slice), drop padded rows.
    ml = ml[:M].reshape(B, N, twoL)
    return ml[..., :L], ml[..., L:]


def _reference(node_features, node_mask, w_embed, w_proj, b_proj):
    h = jnp.einsum("bnd,hd->bnh", node_features, w_embed)
    ml = jnp.einsum("bnh,oh->bno", h, w_proj) + b_proj
    L = ml.shape[-1] // 2
    return ml[..., :L] * node_mask, ml[..., L:] * node_mask


if __name__ == "__main__":
    # Small shapes consistent with the module's forward signature.
    B, N = 2, 16                 # batch, num_nodes
    Din, H, L = 8, 32, 16        # input_feature_dim, hidden_feature_dim, latent_feature_dim

    key = jax.random.PRNGKey(0)
    k_x, k_adj, k_mask, k_we, k_wp, k_bp = jax.random.split(key, 6)

    node_features = jax.random.normal(k_x, (B, N, Din), dtype=jnp.float32)
    adjacency_matrix = (jax.random.uniform(k_adj, (B, N, N)) > 0.5).astype(jnp.float32)
    node_mask = (jax.random.uniform(k_mask, (B, N, 1)) > 0.25).astype(jnp.float32)

    # PyTorch Linear weight convention: [out, in].
    w_embed = jax.random.normal(k_we, (H, Din), dtype=jnp.float32) * 0.1
    w_proj = jax.random.normal(k_wp, (2 * L, H), dtype=jnp.float32) * 0.1
    b_proj = jax.random.normal(k_bp, (2 * L,), dtype=jnp.float32) * 0.1

    ref_mean, ref_logvar = _reference(node_features, node_mask, w_embed, w_proj, b_proj)

    # Fused (default) path.
    mean, logvar = graph_encoder_forward(
        node_features, adjacency_matrix, node_mask, w_embed, w_proj, b_proj)
    jax.block_until_ready((mean, logvar))
    assert jnp.allclose(mean, ref_mean, atol=1e-5, rtol=1e-5)
    assert jnp.allclose(logvar, ref_logvar, atol=1e-5, rtol=1e-5)

    # Unfused two-matmul path (kept for a future non-identity encode()).
    mean2, logvar2 = graph_encoder_forward(
        node_features, adjacency_matrix, node_mask, w_embed, w_proj, b_proj,
        fuse_weights=False)
    jax.block_until_ready((mean2, logvar2))
    assert jnp.allclose(mean2, ref_mean, atol=1e-5, rtol=1e-5)
    assert jnp.allclose(logvar2, ref_logvar, atol=1e-5, rtol=1e-5)

    # Ragged shape to exercise the M-padding path.
    Br, Nr = 3, 10
    nf_r = jax.random.normal(k_x, (Br, Nr, Din), dtype=jnp.float32)
    adj_r = jnp.zeros((Br, Nr, Nr), dtype=jnp.float32)
    mask_r = (jax.random.uniform(k_mask, (Br, Nr, 1)) > 0.25).astype(jnp.float32)
    mean_r, logvar_r = graph_encoder_forward(nf_r, adj_r, mask_r, w_embed, w_proj, b_proj)
    jax.block_until_ready((mean_r, logvar_r))
    ref_mean_r, ref_logvar_r = _reference(nf_r, mask_r, w_embed, w_proj, b_proj)
    assert jnp.allclose(mean_r, ref_mean_r, atol=1e-5, rtol=1e-5)
    assert jnp.allclose(logvar_r, ref_logvar_r, atol=1e-5, rtol=1e-5)

    print("KERNEL_OK")
</pallas_src>

<mosaic_0001>
module attributes {stable_mosaic.version = 11 : i64} {
  func.func @_fused_kernel(%arg0: i32, %arg1: memref<32x8xf32, #tpu.memory_space<vmem>>, %arg2: memref<32x1xf32, #tpu.memory_space<vmem>>, %arg3: memref<8x32xf32, #tpu.memory_space<vmem>>, %arg4: memref<1x32xf32, #tpu.memory_space<vmem>>, %arg5: memref<32x32xf32, #tpu.memory_space<vmem>>) attributes {dimension_semantics = [#tpu.dimension_semantics<parallel>], iteration_bounds = array<i64: 1>, scalar_prefetch = 0 : i64, scratch_operands = 0 : i64, tpu.core_type = #tpu.core_type<tc>, window_params = [{transform_indices = @transform_0, window_bounds = array<i64: 32, 8>}, {transform_indices = @transform_1, window_bounds = array<i64: 32, 1>}, {pipeline_mode = #tpu.pipeline_mode<synchronous>, transform_indices = @transform_2, window_bounds = array<i64: 8, 32>}, {pipeline_mode = #tpu.pipeline_mode<synchronous>, transform_indices = @transform_3, window_bounds = array<i64: 1, 32>}, {transform_indices = @transform_4, window_bounds = array<i64: 32, 32>}]} {
    %c0 = arith.constant 0 : index
    %c0_0 = arith.constant 0 : index
    %0 = vector.load %arg1[%c0, %c0_0] : memref<32x8xf32, #tpu.memory_space<vmem>>, vector<32x8xf32>
    %c0_1 = arith.constant 0 : index
    %c0_2 = arith.constant 0 : index
    %1 = vector.load %arg3[%c0_1, %c0_2] : memref<8x32xf32, #tpu.memory_space<vmem>>, vector<8x32xf32>
    %cst = arith.constant dense<0.000000e+00> : vector<32x32xf32>
    %2 = tpu.matmul %0, %1, %cst {dimension_numbers = #tpu.dot_dimension_numbers<[1], [0], [0], [1], [0, 0, 1, 1], [], []>} : vector<32x8xf32>, vector<8x32xf32>, vector<32x32xf32> -> vector<32x32xf32>
    %c0_3 = arith.constant 0 : index
    %c0_4 = arith.constant 0 : index
    %3 = vector.load %arg4[%c0_3, %c0_4] : memref<1x32xf32, #tpu.memory_space<vmem>>, vector<1x32xf32>
    %4 = vector.broadcast %3 : vector<1x32xf32> to vector<32x32xf32>
    %5 = arith.addf %2, %4 : vector<32x32xf32>
    %c0_5 = arith.constant 0 : index
    %c0_6 = arith.constant 0 : index
    %6 = vector.load %arg2[%c0_5, %c0_6] : memref<32x1xf32, #tpu.memory_space<vmem>>, vector<32x1xf32>
    %7 = vector.broadcast %6 : vector<32x1xf32> to vector<32x32xf32>
    %8 = arith.mulf %5, %7 : vector<32x32xf32>
    %c0_7 = arith.constant 0 : index
    %c0_8 = arith.constant 0 : index
    %9 = vector.load %arg5[%c0_7, %c0_8] : memref<32x32xf32, #tpu.memory_space<vmem>>, vector<32x32xf32>
    tpu.vector_store %arg5[%c0_7, %c0_8], %8 {strides = array<i32>} : memref<32x32xf32, #tpu.memory_space<vmem>>, vector<32x32xf32>,
    return
  }
  func.func @transform_0(%arg0: i32) -> (i32, i32) {
    %c0_i32 = arith.constant 0 : i32
    %c0_i32_0 = arith.constant 0 : i32
    return %arg0, %c0_i32 : i32, i32
  }
  func.func @transform_1(%arg0: i32) -> (i32, i32) {
    %c0_i32 = arith.constant 0 : i32
    %c0_i32_0 = arith.constant 0 : i32
    return %arg0, %c0_i32 : i32, i32
  }
  func.func @transform_2(%arg0: i32) -> (i32, i32) {
    %c0_i32 = arith.constant 0 : i32
    %c0_i32_0 = arith.constant 0 : i32
    %c0_i32_1 = arith.constant 0 : i32
    return %c0_i32, %c0_i32_0 : i32, i32
  }
  func.func @transform_3(%arg0: i32) -> (i32, i32) {
    %c0_i32 = arith.constant 0 : i32
    %c0_i32_0 = arith.constant 0 : i32
    %c0_i32_1 = arith.constant 0 : i32
    return %c0_i32, %c0_i32_0 : i32, i32
  }
  func.func @transform_4(%arg0: i32) -> (i32, i32) {
    %c0_i32 = arith.constant 0 : i32
    %c0_i32_0 = arith.constant 0 : i32
    return %arg0, %c0_i32 : i32, i32
  }
}

</mosaic_0001>

<bundles_post_ra>
// kernel: tpu_custom_call.1
= control target key start
LH: loop header
LB: loop body
LE: loop exit
PB: predicated region body
PF: predicated region fallthrough
CT: control target
= control target key end

     0   :  { %vm27_vm0 = vcmask 64512   ;;  %s226_s0 = inlined_call_operand.vmem [shape: f32[32,8], index: 0, kind: input, shape index: {}]   ;;  %s227_s1 = inlined_call_operand.vmem [shape: f32[32,1], index: 1, kind: input, shape index: {}]   ;;  %s228_s2 = inlined_call_operand.vmem [shape: f32[8,32], index: 2, kind: input, shape index: {}]   ;;  %s229_s3 = inlined_call_operand.vmem [shape: f32[1,32], index: 3, kind: input, shape index: {}]   ;;  %s230_s4 = inlined_call_operand.hbm [shape: f32[32,32], index: 4, kind: output, shape index: {}]  }
   0x1   :  { %v22_v0 = vld [vmem:[%s228_s2] sm:$0xff]  ;;  %v19_v2 = vld [vmem:[%s226_s0 + $0x8] sm:$0xff]  ;;  %v20_v3 = vld [vmem:[%s226_s0 + $0x10] sm:$0xff] }
   0x2   :  { %v18_v1 = vld [vmem:[%s226_s0] sm:$0xff]  ;;  %55 = vmatpush.msra.mxu0 %v22_v0  ;;  %124 = vmatpush.msra.mxu1 %v22_v0  ;;  %v21_v4 = vld [vmem:[%s226_s0 + $0x18] sm:$0xff]  ;;  %v71_v5 = vld [vmem:[%s227_s1 + $0x10] sm:$0xff] }
   0x3   :  { %125 = vmatpush.msra.mxu2 %v22_v0  ;;  %126 = vmatpush.msra.mxu3 %v22_v0  ;;  %v69_v6 = vld [vmem:[%s227_s1] sm:$0xff] }
   0x4   :  { %120 = vmatmul.msk.f32.vlgmr.msra.gmra.mxu0 %vm27_vm0, %v18_v1  ;;  %121 = vmatmul.msk.f32.vlgmr.msra.gmra.mxu1 %vm27_vm0, %v19_v2 }
   0x5   :  { %9 = vsyncpa [#allocation3], 0  ;;  %122 = vmatmul.msk.f32.vlgmr.msra.gmra.mxu2 %vm27_vm0, %v20_v3  ;;  %123 = vmatmul.msk.f32.vlgmr.msra.gmra.mxu3 %vm27_vm0, %v21_v4  ;;  %v160_v7 = vmov 0   ;;  %v72_v8 = vld [vmem:[%s227_s1 + $0x18] sm:$0xff]  ;;  %v70_v9 = vld [vmem:[%s227_s1 + $0x8] sm:$0xff]  ;;  %vm97_vm1 = vcmask 261120  }
   0x6   :  { %132 = vset.pattern.permute.xlu1 %v160_v7  ;;  %131 = vset.pattern.permute.xlu0 %v160_v7  ;;  %v133_v11 = vld [vmem:[%s229_s3] ss:$0 sm:$0xff]  ;;  %s161_s1 = smov [#allocation2]   ;;  %s108_s3 = sshll.u32 %s230_s4, 4  ;;  %s109_s3 = int_to_ptr.hbm [resolvable:$true] %s108_s3 }
   0x7   :  { %85 = vperm.xlu1 %132, %v71_v5   ;;  %75 = vperm.xlu0 %131, %v69_v6   ;;  %s106_s7 = sshll.u32 %s161_s1, 4  ;;  %s162_s10 = smov 128   ;;  %s107_s7 = int_to_ptr.vmem [resolvable:$true] %s106_s7 }
   0x8   :  { %s163_s11 = smov 8  }
   0xf   :  { %90 = vperm.xlu1 %132, %v72_v8   ;;  %80 = vperm.xlu0 %131, %v70_v9  }
  0x79   :  { %v76_v10 = vpop.permute.xlu0 %75  ;;  %v86_v12 = vpop.permute.xlu1 %85 }
  0x81   :  { %v57_v13 = vpop.f32.mrf.mxu0  ;;  %v60_v14 = vpop.f32.mrf.mxu1 }
  0x82   :  { %v58_v15 = vadd.f32 %v133_v11, %v57_v13  ;;  %v61_v16 = vadd.f32 %v133_v11, %v60_v14  ;;  %v81_v17 = vpop.permute.xlu0 %80  ;;  %v91_v24 = vpop.permute.xlu1 %90 }
  0x84   :  { %v93_v18 = vmul.f32 %v76_v10, %v58_v15  ;;  %v94_v19 = vmul.f32 %v81_v17, %v61_v16 }
  0x86   :  { %98 = vst.msk [vmem:[#allocation2] sm:$0xff] %vm97_vm1, %v93_v18 }
  0x87   :  { %99 = vst.msk [vmem:[#allocation2 + $0x8] sm:$0xff] %vm97_vm1, %v94_v19 }
  0x88   :  { %v63_v20 = vpop.f32.mrf.mxu2  ;;  %v66_v21 = vpop.f32.mrf.mxu3 }
  0x89   :  { %v64_v22 = vadd.f32 %v133_v11, %v63_v20  ;;  %v67_v23 = vadd.f32 %v133_v11, %v66_v21 }
  0x8b   :  { %v95_v25 = vmul.f32 %v86_v12, %v64_v22  ;;  %v96_v26 = vmul.f32 %v91_v24, %v67_v23 }
  0x8d   :  { %100 = vst.msk [vmem:[#allocation2 + $0x10] sm:$0xff] %vm97_vm1, %v95_v25 }
  0x8e   :  { %101 = vst.msk [vmem:[#allocation2 + $0x18] sm:$0xff] %vm97_vm1, %v96_v26 }
  0x8f   :  { %114 = dma.vmem_to_hbm [thread:$0]  %s107_s7, 512, %s109_s3, [#allocation3], %s162_s10, %s162_s10, %s163_s11  }
  0x90   :  { %158 = dma.done.wait [#allocation3], 512  }
  0x91   :  { %159 = vsyncadd [#allocation3], 4294966784 }
  0x92   :  { %119 = vsyncpa [#allocation3], 1 }

</bundles_post_ra>
